<compile_context>
chip_gen: v7x
topology: tpu7x:2x2x1
jax: 0.10.0
libtpu: 0.0.40
codegen_flags: <defaults>
</compile_context>

<pallas_src>
import math

import jax
import jax.numpy as jnp
from jax import lax
from jax.experimental import pallas as pl
from jax.experimental.pallas import tpu as pltpu


# ---------------------------------------------------------------------------
# Kernels
# ---------------------------------------------------------------------------

def _film_split_kernel(x_ref, cond_ref, wg_ref, wb_ref, b_ref, o_ref):
    """Fused FiLM, separate gamma/beta matmuls (used when D % 128 != 0).

    x/o: (T, D)   cond: (T, Dc)   wg/wb: (D, Dc)   b: (2, D)
    """
    cond = cond_ref[...]
    dims = (((1,), (1,)), ((), ()))            # contract over Dc of both (trans_b)
    gamma = lax.dot_general(cond, wg_ref[...], dims,
                            preferred_element_type=jnp.float32) + b_ref[0:1, :]
    beta = lax.dot_general(cond, wb_ref[...], dims,
                           preferred_element_type=jnp.float32) + b_ref[1:2, :]
    o_ref[...] = (x_ref[...] * gamma + beta).astype(o_ref.dtype)


def _film_packed_kernel(x_ref, cond_ref, w_ref, b_ref, o_ref):
    """Fused FiLM, single (Dc x 2D) matmul (requires D % 128 == 0).

    x/o: (T, D)   cond: (T, Dc)   w: (2D, Dc)   b: (1, 2D)
    """
    dims = (((1,), (1,)), ((), ()))
    gb = lax.dot_general(cond_ref[...], w_ref[...], dims,
                         preferred_element_type=jnp.float32) + b_ref[...]
    d = o_ref.shape[-1]
    gamma = gb[:, :d]                          # lane-aligned static slices
    beta = gb[:, d:]
    o_ref[...] = (x_ref[...] * gamma + beta).astype(o_ref.dtype)


def _film_affine_kernel(x_ref, g_ref, b_ref, o_ref):
    """Pure elementwise affine; gamma/beta are per-batch, broadcast over rows.

    x/o: (1, T, D)   g/b: (1, 1, D)
    """
    o_ref[...] = (x_ref[...] * g_ref[...] + b_ref[...]).astype(o_ref.dtype)


# ---------------------------------------------------------------------------
# Tiling helpers
# ---------------------------------------------------------------------------

def _round_up(n, m):
    return ((n + m - 1) // m) * m


def _sublane(itemsize):
    # f32 -> 8, bf16 -> 16, int8/fp8 -> 32 (sublane packing of sub-32-bit dtypes)
    return max(8, 32 // max(1, itemsize))


def _vmem_budget():
    """Generation-aware VMEM envelope: (tile budget bytes, vmem_limit_bytes)."""
    cap = 64 << 20
    try:
        info = pltpu.get_tpu_info()
        cap = int(getattr(info, "vmem_capacity_bytes", cap)) or cap
    except Exception:
        pass
    limit = min(cap * 3 // 4, 100 << 20)       # headroom for Mosaic internal scratch
    return limit // 2, limit


def _pick_rows_fused(R, D, Dc, x_it, c_it, o_it, w_it, budget, sublane):
    # Double-buffered x / cond / out blocks + f32 gamma/beta/result temporaries.
    per_row = 2 * D * x_it + 2 * Dc * c_it + 2 * D * o_it + 4 * 3 * D
    # Resident weights + bias (pipeline double-buffers them even though the
    # constant index_map means they are only DMA'd once).
    fixed = 2 * w_it * 2 * Dc * D + 2 * w_it * 2 * D
    avail = max(budget - fixed, sublane * per_row)
    t = max(sublane, (avail // per_row) // sublane * sublane)
    t = min(t, 2048)                           # past ~85% of HBM roofline anyway
    t = min(t, _round_up(R, sublane))
    # >=4 grid steps when the problem is big enough: both v7x TensorCores get
    # >=2 pipelined steps (prefetch i+1 / compute i / writeback i-1).
    if R >= 4 * sublane and 4 * t > _round_up(R, sublane):
        t = max(sublane, _round_up(-(-R // 4), sublane))
    return int(t)


def _run_structure(lead_x, lead_c):
    """Return (Bc, S) if each cond row conditions a contiguous run of x rows."""
    if len(lead_c) > len(lead_x):
        return None
    pad = (1,) * (len(lead_x) - len(lead_c)) + tuple(lead_c)
    k = len(pad)
    while k > 0 and pad[k - 1] == 1:
        k -= 1
    if tuple(pad[:k]) != tuple(lead_x[:k]):
        return None
    return math.prod(lead_x[:k]), math.prod(lead_x[k:])


# ---------------------------------------------------------------------------
# pallas_call wrappers
# ---------------------------------------------------------------------------

def _film_rows(x2, c2, w, b, out_dtype, tile_rows):
    """One cond row per x row: matmul fused into the kernel."""
    R, D = x2.shape
    Dc = c2.shape[-1]
    o_it = jnp.dtype(out_dtype).itemsize
    budget, vmem_limit = _vmem_budget()
    sub = _sublane(x2.dtype.itemsize)
    if tile_rows is None:
        tile_rows = _pick_rows_fused(R, D, Dc, x2.dtype.itemsize, c2.dtype.itemsize,
                                     o_it, w.dtype.itemsize, budget, sub)
    grid = (pl.cdiv(R, tile_rows),)            # ragged tail masked by Pallas

    cost = pl.CostEstimate(
        flops=4 * R * Dc * D + 2 * R * D,
        transcendentals=0,
        bytes_accessed=(x2.size * x2.dtype.itemsize + c2.size * c2.dtype.itemsize
                        + w.size * w.dtype.itemsize + b.size * b.dtype.itemsize
                        + R * D * o_it),
    )

    if D % 128 == 0:
        # Single MXU issue per tile; split with lane-aligned slices.
        kernel = _film_packed_kernel
        operands = (x2, c2, w, b.reshape(1, 2 * D))
        w_specs = [pl.BlockSpec((2 * D, Dc), lambda i: (0, 0)),
                   pl.BlockSpec((1, 2 * D), lambda i: (0, 0))]
    else:
        # TODO(synk): D not a multiple of 128 -> masked (vst.msk) output stores;
        # pad D to 128 upstream if this op ever dominates a profile.
        kernel = _film_split_kernel
        wg = w[:D, :]                          # contiguous slices -> no transpose op
        wb = w[D:, :]
        operands = (x2, c2, wg, wb, b.reshape(2, D))
        w_specs = [pl.BlockSpec((D, Dc), lambda i: (0, 0)),
                   pl.BlockSpec((D, Dc), lambda i: (0, 0)),
                   pl.BlockSpec((2, D), lambda i: (0, 0))]

    return pl.pallas_call(
        kernel,
        out_shape=jax.ShapeDtypeStruct((R, D), out_dtype),
        grid_spec=pltpu.PrefetchScalarGridSpec(
            num_scalar_prefetch=0,
            grid=grid,
            in_specs=[pl.BlockSpec((tile_rows, D), lambda i: (i, 0)),
                      pl.BlockSpec((tile_rows, Dc), lambda i: (i, 0))] + w_specs,
            out_specs=pl.BlockSpec((tile_rows, D), lambda i: (i, 0)),
        ),
        compiler_params=pltpu.CompilerParams(
            dimension_semantics=("parallel",),
            vmem_limit_bytes=vmem_limit,
        ),
        cost_estimate=cost,
    )(*operands)


def _film_affine(x3, gamma2, beta2, out_dtype, tile_rows):
    """Per-batch gamma/beta (precomputed): pure elementwise, mem-bound."""
    Bc, S, D = x3.shape
    x_it = x3.dtype.itemsize
    o_it = jnp.dtype(out_dtype).itemsize
    budget, vmem_limit = _vmem_budget()
    sub = _sublane(x_it)
    if tile_rows is None:
        per_row = 2 * D * (x_it + o_it) + 4 * D          # x/out blocks + f32 temp
        fixed = 2 * 2 * 4 * D                            # gamma + beta residency
        t = max(sub, (max(budget - fixed, sub * per_row) // per_row) // sub * sub)
        tile_rows = int(min(t, 2048, _round_up(S, sub)))
    grid = (Bc, pl.cdiv(S, tile_rows))

    g3 = gamma2.reshape(Bc, 1, D)
    b3 = beta2.reshape(Bc, 1, D)

    cost = pl.CostEstimate(
        flops=2 * Bc * S * D,
        transcendentals=0,
        bytes_accessed=Bc * S * D * (x_it + o_it) + 2 * Bc * D * 4,
    )

    return pl.pallas_call(
        _film_affine_kernel,
        out_shape=jax.ShapeDtypeStruct((Bc, S, D), out_dtype),
        grid_spec=pltpu.PrefetchScalarGridSpec(
            num_scalar_prefetch=0,
            grid=grid,
            in_specs=[pl.BlockSpec((1, tile_rows, D), lambda bi, i: (bi, i, 0)),
                      pl.BlockSpec((1, 1, D), lambda bi, i: (bi, 0, 0)),
                      pl.BlockSpec((1, 1, D), lambda bi, i: (bi, 0, 0))],
            out_specs=pl.BlockSpec((1, tile_rows, D), lambda bi, i: (bi, i, 0)),
        ),
        compiler_params=pltpu.CompilerParams(
            dimension_semantics=("parallel", "parallel"),
            vmem_limit_bytes=vmem_limit,
        ),
        cost_estimate=cost,
    )(x3, g3, b3)


def film(x, cond, w, b, *, tile_rows=None):
    """FiLM forward: gamma, beta = (cond @ w.T + b).chunk(2, -1); x * gamma + beta.

    x:    [..., D]
    cond: [... broadcastable against x's leading dims ..., D_cond]
    w:    (2*D, D_cond)   -- torch nn.Linear weight layout
    b:    (2*D,)
    """
    D = x.shape[-1]
    Dc = cond.shape[-1]
    assert w.shape == (2 * D, Dc), (w.shape, D, Dc)
    assert b.shape == (2 * D,), b.shape

    lead_x = x.shape[:-1]
    lead_c = cond.shape[:-1]

    if lead_c == lead_x:
        # One cond row per x row -> fuse the (cond @ W) matmul into the kernel.
        out = _film_rows(x.reshape(-1, D), cond.reshape(-1, Dc), w, b, x.dtype, tile_rows)
        return out.reshape(x.shape)

    run = _run_structure(lead_x, lead_c)
    if run is not None:
        # cond conditions contiguous runs of x rows (e.g. cond (B,1,Dc) or (Dc,)
        # against x (B,S,D)): compute gamma/beta ONCE per cond row with a tiny
        # plain-JAX matmul, then run a pure elementwise affine kernel — no Sx
        # redundant MXU work, no broadcast cond materialized in HBM.
        Bc, S = run
        gb = jnp.einsum("...c,oc->...o", cond, w,
                        preferred_element_type=jnp.float32) + b.astype(jnp.float32)
        gamma = gb[..., :D].reshape(Bc, D)
        beta = gb[..., D:].reshape(Bc, D)
        out = _film_affine(x.reshape(Bc, S, D), gamma, beta, x.dtype, tile_rows)
        return out.reshape(x.shape)

    # Arbitrary broadcast pattern: correctness-only fallback (materializes cond).
    cond_b = jnp.broadcast_to(cond, lead_x + (Dc,))
    out = _film_rows(x.reshape(-1, D), cond_b.reshape(-1, Dc), w, b, x.dtype, tile_rows)
    return out.reshape(x.shape)


# ---------------------------------------------------------------------------
# Self-test
# ---------------------------------------------------------------------------

if __name__ == "__main__":
    key = jax.random.PRNGKey(0)
    k1, k2, k3, k4, k5 = jax.random.split(key, 5)

    def torch_linear_params(kw, kb, d_out, d_in):
        bound = 1.0 / math.sqrt(d_in)
        w_ = jax.random.uniform(kw, (d_out, d_in), jnp.float32, minval=-bound, maxval=bound)
        b_ = jax.random.uniform(kb, (d_out,), jnp.float32, minval=-bound, maxval=bound)
        return w_, b_

    def ref_film(x_, cond_, w_, b_):
        gb = jnp.einsum("...c,oc->...o", cond_, w_) + b_
        d = x_.shape[-1]
        return x_ * gb[..., :d] + gb[..., d:]

    B, S, D, Dc = 2, 8, 32, 16
    x = jax.random.normal(k1, (B, S, D), dtype=jnp.float32)
    w, b = torch_linear_params(k3, k4, 2 * D, Dc)

    # 1) per-row cond -> fused matmul-in-kernel path (D % 128 != 0: split weights)
    cond_rows = jax.random.normal(k2, (B, S, Dc), dtype=jnp.float32)
    y1 = film(x, cond_rows, w, b)
    jax.block_until_ready(y1)
    assert jnp.allclose(y1, ref_film(x, cond_rows, w, b), atol=1e-4, rtol=1e-4), "path A mismatch"

    # 2) broadcast cond -> per-batch gamma/beta + pure elementwise affine kernel
    cond_bcast = jax.random.normal(k5, (B, 1, Dc), dtype=jnp.float32)
    y2 = film(x, cond_bcast, w, b)
    jax.block_until_ready(y2)
    assert jnp.allclose(y2, ref_film(x, cond_bcast, w, b), atol=1e-4, rtol=1e-4), "path B mismatch"

    # 3) lane-aligned D -> single fused (Dc x 2D) matmul path
    D2 = 128
    x128 = jax.random.normal(k1, (B, S, D2), dtype=jnp.float32)
    w2, b2 = torch_linear_params(k4, k3, 2 * D2, Dc)
    cond128 = jax.random.normal(k2, (B, S, Dc), dtype=jnp.float32)
    y3 = film(x128, cond128, w2, b2)
    jax.block_until_ready(y3)
    assert jnp.allclose(y3, ref_film(x128, cond128, w2, b2), atol=1e-4, rtol=1e-4), "path C mismatch"

    print("KERNEL_OK")
</pallas_src>

<mosaic_0001>
module attributes {stable_mosaic.version = 11 : i64} {
  func.func @_film_split_kernel(%arg0: i32, %arg1: memref<16x32xf32, #tpu.memory_space<vmem>>, %arg2: memref<16x16xf32, #tpu.memory_space<vmem>>, %arg3: memref<32x16xf32, #tpu.memory_space<vmem>>, %arg4: memref<32x16xf32, #tpu.memory_space<vmem>>, %arg5: memref<2x32xf32, #tpu.memory_space<vmem>>, %arg6: memref<16x32xf32, #tpu.memory_space<vmem>>) attributes {dimension_semantics = [#tpu.dimension_semantics<parallel>], iteration_bounds = array<i64: 1>, scalar_prefetch = 0 : i64, scratch_operands = 0 : i64, tpu.core_type = #tpu.core_type<tc>, window_params = [{transform_indices = @transform_0, window_bounds = array<i64: 16, 32>}, {transform_indices = @transform_1, window_bounds = array<i64: 16, 16>}, {pipeline_mode = #tpu.pipeline_mode<synchronous>, transform_indices = @transform_2, window_bounds = array<i64: 32, 16>}, {pipeline_mode = #tpu.pipeline_mode<synchronous>, transform_indices = @transform_3, window_bounds = array<i64: 32, 16>}, {pipeline_mode = #tpu.pipeline_mode<synchronous>, transform_indices = @transform_4, window_bounds = array<i64: 2, 32>}, {transform_indices = @transform_5, window_bounds = array<i64: 16, 32>}]} {
    %c0 = arith.constant 0 : index
    %c0_0 = arith.constant 0 : index
    %0 = vector.load %arg2[%c0, %c0_0] : memref<16x16xf32, #tpu.memory_space<vmem>>, vector<16x16xf32>
    %c0_1 = arith.constant 0 : index
    %c0_2 = arith.constant 0 : index
    %1 = vector.load %arg3[%c0_1, %c0_2] : memref<32x16xf32, #tpu.memory_space<vmem>>, vector<32x16xf32>
    %cst = arith.constant dense<0.000000e+00> : vector<16x32xf32>
    %2 = tpu.matmul %0, %1, %cst {dimension_numbers = #tpu.dot_dimension_numbers<[1], [1], [0], [0], [0, 0, 1, 0], [], []>} : vector<16x16xf32>, vector<32x16xf32>, vector<16x32xf32> -> vector<16x32xf32>
    %c0_3 = arith.constant 0 : index
    %c0_4 = arith.constant 0 : index
    %3 = vector.load %arg5[%c0_3, %c0_4] : memref<2x32xf32, #tpu.memory_space<vmem>>, vector<1x32xf32>
    %4 = vector.broadcast %3 : vector<1x32xf32> to vector<16x32xf32>
    %5 = arith.addf %2, %4 : vector<16x32xf32>
    %c0_5 = arith.constant 0 : index
    %c0_6 = arith.constant 0 : index
    %6 = vector.load %arg4[%c0_5, %c0_6] : memref<32x16xf32, #tpu.memory_space<vmem>>, vector<32x16xf32>
    %cst_7 = arith.constant dense<0.000000e+00> : vector<16x32xf32>
    %7 = tpu.matmul %0, %6, %cst_7 {dimension_numbers = #tpu.dot_dimension_numbers<[1], [1], [0], [0], [0, 0, 1, 0], [], []>} : vector<16x16xf32>, vector<32x16xf32>, vector<16x32xf32> -> vector<16x32xf32>
    %c1 = arith.constant 1 : index
    %c0_8 = arith.constant 0 : index
    %8 = vector.load %arg5[%c1, %c0_8] : memref<2x32xf32, #tpu.memory_space<vmem>>, vector<1x32xf32>
    %9 = vector.broadcast %8 : vector<1x32xf32> to vector<16x32xf32>
    %10 = arith.addf %7, %9 : vector<16x32xf32>
    %c0_9 = arith.constant 0 : index
    %c0_10 = arith.constant 0 : index
    %11 = vector.load %arg1[%c0_9, %c0_10] : memref<16x32xf32, #tpu.memory_space<vmem>>, vector<16x32xf32>
    %12 = arith.mulf %11, %5 : vector<16x32xf32>
    %13 = arith.addf %12, %10 : vector<16x32xf32>
    %c0_11 = arith.constant 0 : index
    %c0_12 = arith.constant 0 : index
    %14 = vector.load %arg6[%c0_11, %c0_12] : memref<16x32xf32, #tpu.memory_space<vmem>>, vector<16x32xf32>
    tpu.vector_store %arg6[%c0_11, %c0_12], %13 {strides = array<i32>} : memref<16x32xf32, #tpu.memory_space<vmem>>, vector<16x32xf32>,
    return
  }
  func.func @transform_0(%arg0: i32) -> (i32, i32) {
    %c0_i32 = arith.constant 0 : i32
    %c0_i32_0 = arith.constant 0 : i32
    return %arg0, %c0_i32 : i32, i32
  }
  func.func @transform_1(%arg0: i32) -> (i32, i32) {
    %c0_i32 = arith.constant 0 : i32
    %c0_i32_0 = arith.constant 0 : i32
    return %arg0, %c0_i32 : i32, i32
  }
  func.func @transform_2(%arg0: i32) -> (i32, i32) {
    %c0_i32 = arith.constant 0 : i32
    %c0_i32_0 = arith.constant 0 : i32
    %c0_i32_1 = arith.constant 0 : i32
    return %c0_i32, %c0_i32_0 : i32, i32
  }
  func.func @transform_3(%arg0: i32) -> (i32, i32) {
    %c0_i32 = arith.constant 0 : i32
    %c0_i32_0 = arith.constant 0 : i32
    %c0_i32_1 = arith.constant 0 : i32
    return %c0_i32, %c0_i32_0 : i32, i32
  }
  func.func @transform_4(%arg0: i32) -> (i32, i32) {
    %c0_i32 = arith.constant 0 : i32
    %c0_i32_0 = arith.constant 0 : i32
    %c0_i32_1 = arith.constant 0 : i32
    return %c0_i32, %c0_i32_0 : i32, i32
  }
  func.func @transform_5(%arg0: i32) -> (i32, i32) {
    %c0_i32 = arith.constant 0 : i32
    %c0_i32_0 = arith.constant 0 : i32
    return %arg0, %c0_i32 : i32, i32
  }
}

</mosaic_0001>

<bundles_post_ra>
// kernel: tpu_custom_call.1
= control target key start
LH: loop header
LB: loop body
LE: loop exit
PB: predicated region body
PF: predicated region fallthrough
CT: control target
= control target key end

     0   :  { %vm32_vm0 = vcmask 130048   ;;  %s459_s0 = inlined_call_operand.vmem [shape: f32[16,32], index: 0, kind: input, shape index: {}]   ;;  %s460_s1 = inlined_call_operand.vmem [shape: f32[16,16], index: 1, kind: input, shape index: {}]   ;;  %s461_s2 = inlined_call_operand.vmem [shape: f32[32,16], index: 2, kind: input, shape index: {}]   ;;  %s462_s3 = inlined_call_operand.vmem [shape: f32[32,16], index: 3, kind: input, shape index: {}]   ;;  %s463_s4 = inlined_call_operand.vmem [shape: f32[2,32], index: 4, kind: input, shape index: {}]   ;;  %s464_s5 = inlined_call_operand.hbm [shape: f32[16,32], index: 5, kind: output, shape index: {}]  }
   0x1   :  { %v23_v0 = vld [vmem:[%s461_s2] sm:$0xff]  ;;  %v24_v1 = vld [vmem:[%s461_s2 + $0x8] sm:$0xff]  ;;  %vm390_vm1 = vmpackc.low %vm32_vm0, %vm32_vm0 }
   0x2   :  { %v126_v2 = vld [vmem:[%s462_s3] sm:$0xff]  ;;  %v295_v3 = vpack.c.bf16 %v24_v1, %v23_v0  ;;  %v127_v5 = vld [vmem:[%s462_s3 + $0x8] sm:$0xff]  ;;  %v25_v6 = vld [vmem:[%s461_s2 + $0x10] sm:$0xff] }
   0x3   :  { %v307_v7 = vpack.c.bf16 %v127_v5, %v126_v2  ;;  %v26_v8 = vld [vmem:[%s461_s2 + $0x18] sm:$0xff]  ;;  %v128_v9 = vld [vmem:[%s462_s3 + $0x10] sm:$0xff]  ;;  %v21_v13 = vld [vmem:[%s460_s1] sm:$0xff] }
   0x4   :  { %v129_v10 = vld [vmem:[%s462_s3 + $0x18] sm:$0xff]  ;;  %297 = vmatprep.subr.msk.bf16.mxu0 %vm390_vm1, %v295_v3  ;;  %v301_v11 = vpack.c.bf16 %v26_v8, %v25_v6 }
   0x5   :  { %v313_v12 = vpack.c.bf16 %v129_v10, %v128_v9 }
   0x6   :  { %10 = vsyncpa [#allocation3], 0  ;;  %300 = vmatpush3.bf16.xpose.msk.msra.mxu0 %vm390_vm1, %v295_v3  ;;  %309 = vmatprep.subr.msk.bf16.mxu1 %vm390_vm1, %v307_v7  ;;  %v22_v14 = vld [vmem:[%s460_s1 + $0x8] sm:$0xff]  ;;  %v247_v15 = vld [vmem:[%s463_s4] ss:$0 sm:$0xff]  ;;  %s346_s18 = smov [#allocation2]  }
   0x7   :  { %312 = vmatpush3.bf16.xpose.msk.msra.mxu1 %vm390_vm1, %v307_v7  ;;  %303 = vmatprep.subr.msk.bf16.mxu0 %vm390_vm1, %v301_v11  ;;  %v254_v16 = vld [vmem:[%s463_s4 + $0x1] ss:$0 sm:$0xff]  ;;  %v223_v18 = vld [vmem:[%s459_s0 + $0x8] sm:$0xff]  ;;  %s236_s19 = sshll.u32 %s346_s18, 4  ;;  %vm228_vm2 = vcmask 261120   ;;  %s237_s19 = int_to_ptr.vmem [resolvable:$true] %s236_s19 }
   0x8   :  { %315 = vmatprep.subr.msk.bf16.mxu1 %vm390_vm1, %v313_v12  ;;  %281 = vmatprep.mubr.msk.f32.mxu0 %vm32_vm0, %v21_v13  ;;  %v222_v21 = vld [vmem:[%s459_s0] sm:$0xff]  ;;  %s322_s4 = scalar_lea.vmem %s237_s19, 256  ;;  %p327_p1 = scmp.lt.s32.totalorder %s237_s19, %s237_s19 }
   0x9   :  { %292 = vmatprep.mubr.msk.f32.mxu1 %vm32_vm0, %v21_v13  ;;  %p323_p0 = scmp.ne.s32.totalorder %s237_s19, %s322_s4  ;;  %p328_p2 = scmp.lt.s32.totalorder %s322_s4, %s322_s4 }
   0xb   :  { %p329_p3 = por %p328_p2, %p327_p1 }
   0xd   :  { %p330_p4 = pnand %p329_p3, %p323_p0 }
   0xe   :  { %306 = vmatpush3.bf16.xpose.msk.msra.mxu0 %vm390_vm1, %v301_v11 }
   0xf   :  { %318 = vmatpush3.bf16.xpose.msk.msra.mxu1 %vm390_vm1, %v313_v12 }
  0x15   :  { %282 = vmatmul.mubr.msk.f32.vlgmr.msra.gmra.mrb[0].mxu0 %vm32_vm0, %v22_v14 }
  0x16   :  { %293 = vmatmul.mubr.msk.f32.vlgmr.msra.gmra.mrb[0].mxu1 %vm32_vm0, %v22_v14 }
  0xe8   :  { %v283_v17 = vpop.f32.mrb[0].mxu0 }
  0xe9   :  { %v123_v19 = vadd.f32 %v283_v17, %v247_v15  ;;  %v117_v20 = vpop.f32.mrb[1].mxu0  ;;  %v294_v22 = vpop.f32.mrb[0].mxu1 }
  0xea   :  { %v118_v23 = vadd.f32 %v247_v15, %v117_v20  ;;  %v219_v24 = vadd.f32 %v294_v22, %v254_v16  ;;  %v213_v25 = vpop.f32.mrb[1].mxu1 }
  0xeb   :  { %v225_v26 = vmul.f32 %v223_v18, %v123_v19  ;;  %v214_v27 = vadd.f32 %v254_v16, %v213_v25 }
  0xec   :  { %v224_v28 = vmul.f32 %v222_v21, %v118_v23 }
  0xed   :  { %v227_v29 = vadd.f32 %v225_v26, %v219_v24 }
  0xee   :  { %v226_v30 = vadd.f32 %v224_v28, %v214_v27 }
  0xef   :  { %230 = vst.msk [vmem:[#allocation2 + $0x8] sm:$0xff] %vm228_vm2, %v227_v29 }
  0xf0   :  { %229 = vst.msk [vmem:[#allocation2] sm:$0xff] %vm228_vm2, %v226_v30 }
  0xf1   :  { %333 = shalt.err (!%p330_p4)
}
  0xf2   :  { %s334_s21 = scalar_lea.hbm %s464_s5, 256 }
  0xf3   :  { %p335_p5 = scmp.ne.s32.totalorder %s464_s5, %s334_s21  ;;  %p338_p6 = scmp.lt.u32.totalorder %s334_s21, %s464_s5 }
  0xf5   :  { %p340_p7 = pnand %p338_p6, %p335_p5 }
  0xf7   :  { %343 = shalt.err (!%p340_p7)
}
  0xf8   :  { %s347_s26 = smov 128   ;;  %s348_s27 = smov 8  }
  0xf9   :  { %242 = dma.vmem_to_hbm [thread:$0]  %s237_s19, 256, %s464_s5, [#allocation3], %s347_s26, %s347_s26, %s348_s27  }
  0xfa   :  { %344 = dma.done.wait [#allocation3], 256  }
  0xfb   :  { %345 = vsyncadd [#allocation3], 4294967040 }
  0xfc   :  { %246 = vsyncpa [#allocation3], 1 }

</bundles_post_ra>
